<compile_context>
chip_gen: v7x
topology: tpu7x:2x2x1
jax: 0.10.0
libtpu: 0.0.40
codegen_flags: <defaults>
</compile_context>

<pallas_src>
import functools

import jax
import jax.numpy as jnp
from jax.experimental import pallas as pl
from jax.experimental.pallas import tpu as pltpu

LANE = 128
SUBLANE = 8
SUB_ROWS = 512                      # strip-mine chunk: bounds f32 temporaries to ~256 KiB each
MAX_TILE_ROWS = 8192                # cap re-derived for v7x (64 MiB physical VMEM)
DMA_VMEM_BUDGET = 8 * 1024 * 1024   # 2 inputs x 2 pipeline buffers; < v5e's 16 MiB default scoped


def _round_up(a, b):
    return (a + b - 1) // b * b


def _cdiv(a, b):
    return -(-a // b)


def _num_tensorcores_per_chip():
    """Conservative per-chip TensorCore count (1 on v5e/v6e; 2 only if clearly reported)."""
    try:
        info = pltpu.get_tpu_info()
    except Exception:
        return 1
    for name in ("tensorcores_per_chip", "num_tensorcores_per_chip",
                 "cores_per_chip", "num_cores_per_chip"):
        v = getattr(info, name, None)
        if isinstance(v, int) and 1 <= v <= 2:
            return v
    v = getattr(info, "num_cores", None)
    if isinstance(v, int) and v == 2:
        return 2
    return 1


def _loss_elementwise(x, t, pos_weight, normalize):
    """Per-element BCE-with-logits loss (f32), matching PyTorch BCEWithLogitsLoss."""
    x = x.astype(jnp.float32)
    t = t.astype(jnp.float32)
    if normalize:
        t = jnp.where(t >= 3.0, t - 3.0, t)
        y = (t != 0.0).astype(jnp.float32)
    else:
        y = t
    sp_negx = jnp.maximum(-x, 0.0) + jnp.log1p(jnp.exp(-jnp.abs(x)))
    return (1.0 - y) * x + (1.0 + (pos_weight - 1.0) * y) * sp_negx


def _bce_kernel(pw_ref, x_ref, t_ref, out_ref, *,
                normalize, two_axis, steps_per_part, last_block,
                sub_rows, n_sub_full, tail_rows, tail_n_sub,
                tail_is_partial, needs_oob_guard):
    if two_axis:
        part = pl.program_id(0)
        step = pl.program_id(1)
        gb = part * steps_per_part + step          # global block index
    else:
        step = pl.program_id(0)
        gb = step

    @pl.when(step == 0)
    def _init():
        out_ref[...] = jnp.zeros_like(out_ref)

    pos_weight = pw_ref[0]                         # SMEM scalar (no recompile per weight)

    def chunk_partial(off, masked):
        # Strip-mined sub-chunk: load in native dtype, cast to f32 for compute.
        x = x_ref[pl.ds(off, sub_rows), :].astype(jnp.float32)
        t = t_ref[pl.ds(off, sub_rows), :].astype(jnp.float32)
        if normalize:
            t = jnp.where(t >= 3.0, t - 3.0, t)
            y = (t != 0.0).astype(jnp.float32)
        else:
            y = t
        sp_negx = jnp.maximum(-x, 0.0) + jnp.log1p(jnp.exp(-jnp.abs(x)))
        loss = (1.0 - y) * x + (1.0 + (pos_weight - 1.0) * y) * sp_negx
        if masked:
            # Only the tail block pays for this; jnp.where is a select, so garbage/NaN
            # in the ragged out-of-bounds rows is safely discarded.
            row = jax.lax.broadcasted_iota(jnp.int32, loss.shape, 0) + off
            loss = jnp.where(row < tail_rows, loss, 0.0)
        # fold sublane-tile groups with cheap VPU adds -> (8, 128) partial sum
        return loss.reshape(sub_rows // SUBLANE, SUBLANE, LANE).sum(axis=0)

    def block_partial(n_sub, masked):
        if n_sub == 1:
            return chunk_partial(0, masked)

        def body(c, acc):
            off = pl.multiple_of(c * sub_rows, sub_rows)
            return acc + chunk_partial(off, masked)

        # Real loop (not unrolled) bounds live VMEM temporaries per sub-chunk.
        return jax.lax.fori_loop(0, n_sub, body,
                                 jnp.zeros((SUBLANE, LANE), jnp.float32))

    if tail_is_partial:
        @pl.when(gb < last_block)
        def _interior():
            out_ref[...] += block_partial(n_sub_full, False)

        @pl.when(gb == last_block)
        def _tail():
            out_ref[...] += block_partial(tail_n_sub, True)
    elif needs_oob_guard:
        @pl.when(gb <= last_block)
        def _guarded():
            out_ref[...] += block_partial(n_sub_full, False)
    else:
        out_ref[...] += block_partial(n_sub_full, False)


def bce_loss_pallas(x, target, text_weight=1.0, normalize=True, tile_rows=None):
    """Mean BCE-with-logits loss with pos_weight, matching the PyTorch BCELoss module."""
    n = int(x.size)
    assert int(target.size) == n and n > 0

    x_flat = jnp.ravel(x)
    t_flat = jnp.ravel(target)
    pw = jnp.asarray([text_weight], dtype=jnp.float32)

    # <128-element remainder: tiny jnp computation instead of a whole-tensor jnp.pad pass.
    rem = n % LANE
    n_main = n - rem
    if rem:
        tail_sum = jnp.sum(_loss_elementwise(x_flat[n_main:], t_flat[n_main:], pw[0], normalize))
    else:
        tail_sum = jnp.float32(0.0)
    if n_main == 0:
        return tail_sum / jnp.float32(n)

    rows = n_main // LANE
    if rem:
        # TODO(synk): the prefix slice still costs one copy pass; a fully zero-copy path
        # would need a manual-DMA pl.ANY kernel with an element mask.
        x2d = x_flat[:n_main].reshape(rows, LANE)
        t2d = t_flat[:n_main].reshape(rows, LANE)
    else:
        x2d = x_flat.reshape(rows, LANE)     # free reshape (no copy)
        t2d = t_flat.reshape(rows, LANE)

    # Tile sizing: fill the DMA VMEM budget (2 inputs x 2 buffers) from native dtypes.
    # f32+f32 -> 4096 rows, bf16+int8 -> 8192 rows; everything stays below v5e's 16 MiB
    # default scoped VMEM, so no explicit vmem_limit_bytes is required.
    itembytes = x2d.dtype.itemsize + t2d.dtype.itemsize
    cap = DMA_VMEM_BUDGET // (2 * LANE * itembytes)
    cap = max(SUB_ROWS, (cap // SUB_ROWS) * SUB_ROWS)
    cap = min(cap, MAX_TILE_ROWS)
    if tile_rows is None:
        if rows <= SUB_ROWS:
            tile_rows = _round_up(rows, SUBLANE)
        else:
            tile_rows = min(cap, _round_up(rows, SUB_ROWS))
    tile_rows = int(tile_rows)
    assert tile_rows % SUBLANE == 0 and tile_rows > 0

    sub_rows = SUB_ROWS if tile_rows % SUB_ROWS == 0 else tile_rows
    n_sub_full = tile_rows // sub_rows

    total_blocks = _cdiv(rows, tile_rows)
    tail_rows = rows - (total_blocks - 1) * tile_rows
    tail_is_partial = tail_rows != tile_rows
    tail_n_sub = _cdiv(tail_rows, sub_rows)

    # Only split the grid across cores on genuinely multi-TC chips (v7x); on single-TC
    # chips the grid is a serial loop and the split is pure overhead.
    num_parts = min(_num_tensorcores_per_chip(), total_blocks)

    if num_parts <= 1:
        num_parts = 1
        steps_per_part = total_blocks
        needs_oob_guard = False
        two_axis = False
        grid = (total_blocks,)
        in_map = lambda i, pw_ref: (i, 0)
        out_map = lambda i, pw_ref: (0, 0)
        semantics = (pltpu.ARBITRARY,)
    else:
        steps_per_part = _cdiv(total_blocks, num_parts)
        needs_oob_guard = steps_per_part * num_parts != total_blocks
        two_axis = True
        grid = (num_parts, steps_per_part)
        if needs_oob_guard:
            # clamp redundant trailing blocks onto the last real block (compute is skipped)
            in_map = lambda p, i, pw_ref: (jnp.minimum(p * steps_per_part + i,
                                                       total_blocks - 1), 0)
        else:
            in_map = lambda p, i, pw_ref: (p * steps_per_part + i, 0)
        out_map = lambda p, i, pw_ref: (p, 0)
        # CORE_PARALLEL actually shards the leading axis across TensorCores.
        semantics = (pltpu.CORE_PARALLEL, pltpu.ARBITRARY)

    kernel = functools.partial(
        _bce_kernel,
        normalize=bool(normalize),
        two_axis=two_axis,
        steps_per_part=int(steps_per_part),
        last_block=int(total_blocks - 1),
        sub_rows=int(sub_rows),
        n_sub_full=int(n_sub_full),
        tail_rows=int(tail_rows),
        tail_n_sub=int(tail_n_sub),
        tail_is_partial=bool(tail_is_partial),
        needs_oob_guard=bool(needs_oob_guard),
    )

    partials = pl.pallas_call(
        kernel,
        out_shape=jax.ShapeDtypeStruct((num_parts * SUBLANE, LANE), jnp.float32),
        grid_spec=pltpu.PrefetchScalarGridSpec(
            num_scalar_prefetch=1,          # pos_weight -> SMEM scalar
            grid=grid,
            in_specs=[
                pl.BlockSpec((tile_rows, LANE), in_map),
                pl.BlockSpec((tile_rows, LANE), in_map),
            ],
            out_specs=pl.BlockSpec((SUBLANE, LANE), out_map),
        ),
        compiler_params=pltpu.CompilerParams(dimension_semantics=semantics),
    )(pw, x2d, t2d)

    # single tiny cross-lane reduce + mean outside the kernel
    return (jnp.sum(partials) + tail_sum) / jnp.float32(n)


def _reference(x, target, text_weight=1.0, normalize=True):
    return jnp.mean(_loss_elementwise(jnp.ravel(x), jnp.ravel(target),
                                      jnp.float32(text_weight), normalize))


if __name__ == "__main__":
    key = jax.random.PRNGKey(0)
    ks = jax.random.split(key, 8)
    checks = []

    # Case 1: narrow dtypes (bf16 logits, int8 integer-coded targets), default tiling.
    x1 = jax.random.normal(ks[0], (2, 4, 32, 32), dtype=jnp.float32).astype(jnp.bfloat16)
    t1 = jax.random.randint(ks[1], (2, 4, 32, 32), 0, 6).astype(jnp.int8)
    checks.append((bce_loss_pallas(x1, t1, text_weight=2.0, normalize=True),
                   _reference(x1, t1, text_weight=2.0, normalize=True)))

    # Case 2: multi-block grid + ragged tail rows, soft float targets, no normalize.
    x2 = jax.random.normal(ks[2], (2, 4, 31, 32), dtype=jnp.float32)
    t2 = jax.random.uniform(ks[3], (2, 4, 31, 32), dtype=jnp.float32)
    checks.append((bce_loss_pallas(x2, t2, text_weight=1.0, normalize=False, tile_rows=16),
                   _reference(x2, t2, text_weight=1.0, normalize=False)))

    # Case 3: odd block count (exercises the oob-guard path on multi-core chips).
    x3 = jax.random.normal(ks[4], (2, 4, 24, 16), dtype=jnp.float32)
    t3 = jax.random.randint(ks[5], (2, 4, 24, 16), 0, 6)   # int32 targets
    checks.append((bce_loss_pallas(x3, t3, text_weight=3.0, normalize=True, tile_rows=8),
                   _reference(x3, t3, text_weight=3.0, normalize=True)))

    # Case 4: element count not a multiple of 128 -> aligned-prefix kernel + jnp remainder.
    x4 = jax.random.normal(ks[6], (2, 3, 21, 16), dtype=jnp.float32)
    t4 = jax.random.randint(ks[7], (2, 3, 21, 16), 0, 6).astype(jnp.float32)
    checks.append((bce_loss_pallas(x4, t4, text_weight=2.0, normalize=True),
                   _reference(x4, t4, text_weight=2.0, normalize=True)))

    for out, ref in checks:
        out = jax.block_until_ready(out)
        assert jnp.allclose(out, ref, rtol=1e-5, atol=1e-5), (out, ref)

    print("KERNEL_OK")
</pallas_src>

<mosaic_0001>
module attributes {stable_mosaic.version = 11 : i64} {
  func.func @_bce_kernel(%arg0: i32, %arg1: memref<1xf32, #tpu.memory_space<smem>>, %arg2: memref<64x128xbf16, #tpu.memory_space<vmem>>, %arg3: memref<64x128xi8, #tpu.memory_space<vmem>>, %arg4: memref<8x128xf32, #tpu.memory_space<vmem>>) attributes {dimension_semantics = [#tpu.dimension_semantics<arbitrary>], iteration_bounds = array<i64: 1>, scalar_prefetch = 1 : i64, scratch_operands = 0 : i64, tpu.core_type = #tpu.core_type<tc>, window_params = [{transform_indices = @transform_0, window_bounds = array<i64: 64, 128>}, {transform_indices = @transform_1, window_bounds = array<i64: 64, 128>}, {pipeline_mode = #tpu.pipeline_mode<synchronous>, transform_indices = @transform_2, window_bounds = array<i64: 8, 128>}]} {
    %c0_i32 = arith.constant 0 : i32
    %0 = arith.cmpi eq, %arg0, %c0_i32 : i32
    %1 = arith.extui %0 : i1 to i32
    %c0_i32_0 = arith.constant 0 : i32
    %2 = arith.cmpi ne, %1, %c0_i32_0 : i32
    scf.if %2 {
      %cst_18 = arith.constant 0.000000e+00 : f32
      %42 = vector.broadcast %cst_18 : f32 to vector<8x128xf32>
      %c0_19 = arith.constant 0 : index
      %c0_20 = arith.constant 0 : index
      %43 = vector.load %arg4[%c0_19, %c0_20] : memref<8x128xf32, #tpu.memory_space<vmem>>, vector<8x128xf32>
      tpu.vector_store %arg4[%c0_19, %c0_20], %42 {strides = array<i32>} : memref<8x128xf32, #tpu.memory_space<vmem>>, vector<8x128xf32>,
    } else {
    }
    %c0 = arith.constant 0 : index
    %3 = memref.load %arg1[%c0] : memref<1xf32, #tpu.memory_space<smem>>
    %c0_1 = arith.constant 0 : index
    %c0_2 = arith.constant 0 : index
    %4 = vector.load %arg4[%c0_1, %c0_2] : memref<8x128xf32, #tpu.memory_space<vmem>>, vector<8x128xf32>
    %c0_3 = arith.constant 0 : index
    %c0_4 = arith.constant 0 : index
    %5 = vector.load %arg2[%c0_3, %c0_4] : memref<64x128xbf16, #tpu.memory_space<vmem>>, vector<64x128xbf16>
    %6 = arith.extf %5 : vector<64x128xbf16> to vector<64x128xf32>
    %c0_5 = arith.constant 0 : index
    %c0_6 = arith.constant 0 : index
    %7 = vector.load %arg3[%c0_5, %c0_6] : memref<64x128xi8, #tpu.memory_space<vmem>>, vector<64x128xi8>
    %8 = arith.sitofp %7 : vector<64x128xi8> to vector<64x128xf32>
    %cst = arith.constant 3.000000e+00 : f32
    %9 = vector.broadcast %cst : f32 to vector<64x128xf32>
    %10 = arith.cmpf oge, %8, %9 : vector<64x128xf32>
    %cst_7 = arith.constant 3.000000e+00 : f32
    %11 = vector.broadcast %cst_7 : f32 to vector<64x128xf32>
    %12 = arith.subf %8, %11 : vector<64x128xf32>
    %13 = arith.select %10, %12, %8 : vector<64x128xi1>, vector<64x128xf32>
    %cst_8 = arith.constant 0.000000e+00 : f32
    %14 = vector.broadcast %cst_8 : f32 to vector<64x128xf32>
    %15 = arith.cmpf one, %13, %14 : vector<64x128xf32>
    %16 = arith.extui %15 : vector<64x128xi1> to vector<64x128xi32>
    %17 = arith.sitofp %16 : vector<64x128xi32> to vector<64x128xf32>
    %cst_9 = arith.constant 0.000000e+00 : f32
    %18 = vector.broadcast %cst_9 : f32 to vector<64x128xf32>
    %19 = arith.subf %18, %6 : vector<64x128xf32>
    %cst_10 = arith.constant 0.000000e+00 : f32
    %20 = vector.broadcast %cst_10 : f32 to vector<64x128xf32>
    %21 = arith.maximumf %19, %20 : vector<64x128xf32>
    %22 = math.absf %6 : vector<64x128xf32>
    %cst_11 = arith.constant 0.000000e+00 : f32
    %23 = vector.broadcast %cst_11 : f32 to vector<64x128xf32>
    %24 = arith.subf %23, %22 : vector<64x128xf32>
    %25 = math.exp %24 : vector<64x128xf32>
    %26 = math.log1p %25 : vector<64x128xf32>
    %27 = arith.addf %21, %26 : vector<64x128xf32>
    %cst_12 = arith.constant 1.000000e+00 : f32
    %28 = vector.broadcast %cst_12 : f32 to vector<64x128xf32>
    %29 = arith.subf %28, %17 : vector<64x128xf32>
    %30 = arith.mulf %29, %6 : vector<64x128xf32>
    %cst_13 = arith.constant 1.000000e+00 : f32
    %31 = arith.subf %3, %cst_13 : f32
    %32 = vector.broadcast %31 : f32 to vector<64x128xf32>
    %33 = arith.mulf %32, %17 : vector<64x128xf32>
    %cst_14 = arith.constant 1.000000e+00 : f32
    %34 = vector.broadcast %cst_14 : f32 to vector<64x128xf32>
    %35 = arith.addf %34, %33 : vector<64x128xf32>
    %36 = arith.mulf %35, %27 : vector<64x128xf32>
    %37 = arith.addf %30, %36 : vector<64x128xf32>
    %38 = vector.shape_cast %37 : vector<64x128xf32> to vector<8x8x128xf32>
    %cst_15 = arith.constant dense<0.000000e+00> : vector<8x128xf32>
    %39 = vector.multi_reduction <add>, %38, %cst_15 [0] : vector<8x8x128xf32> to vector<8x128xf32>
    %40 = arith.addf %4, %39 : vector<8x128xf32>
    %c0_16 = arith.constant 0 : index
    %c0_17 = arith.constant 0 : index
    %41 = vector.load %arg4[%c0_16, %c0_17] : memref<8x128xf32, #tpu.memory_space<vmem>>, vector<8x128xf32>
    tpu.vector_store %arg4[%c0_16, %c0_17], %40 {strides = array<i32>} : memref<8x128xf32, #tpu.memory_space<vmem>>, vector<8x128xf32>,
    return
  }
  func.func @transform_0(%arg0: i32, %arg1: memref<1xf32, #tpu.memory_space<smem>>) -> (i32, i32) {
    %c0_i32 = arith.constant 0 : i32
    %c0_i32_0 = arith.constant 0 : i32
    return %arg0, %c0_i32 : i32, i32
  }
  func.func @transform_1(%arg0: i32, %arg1: memref<1xf32, #tpu.memory_space<smem>>) -> (i32, i32) {
    %c0_i32 = arith.constant 0 : i32
    %c0_i32_0 = arith.constant 0 : i32
    return %arg0, %c0_i32 : i32, i32
  }
  func.func @transform_2(%arg0: i32, %arg1: memref<1xf32, #tpu.memory_space<smem>>) -> (i32, i32) {
    %c0_i32 = arith.constant 0 : i32
    %c0_i32_0 = arith.constant 0 : i32
    %c0_i32_1 = arith.constant 0 : i32
    return %c0_i32, %c0_i32_0 : i32, i32
  }
}

</mosaic_0001>

<bundles_post_ra>
// kernel: tpu_custom_call.1
= control target key start
LH: loop header
LB: loop body
LE: loop exit
PB: predicated region body
PF: predicated region fallthrough
CT: control target
= control target key end

     0   :  { %9 = vsyncpa [#allocation5], 0  ;;  %s760_s0 = inlined_call_operand.<no memory space> [shape: f32[1], index: 0, kind: input, shape index: {}]   ;;  %s761_s1 = inlined_call_operand.hbm [shape: bf16[64,128], index: 1, kind: input, shape index: {}]   ;;  %s762_s2 = inlined_call_operand.hbm [shape: s8[64,128], index: 2, kind: input, shape index: {}]   ;;  %s763_s3 = inlined_call_operand.hbm [shape: f32[8,128], index: 3, kind: output, shape index: {}]  }
   0x1   :  { %10 = vsyncpa [#allocation8], 0 }
   0x2   :  { %11 = vsyncpa [#allocation6], 0  ;;  %s482_s12 = smov [#allocation4]   ;;  %s410_s16 = scalar_lea.hbm %s761_s1, 512 }
   0x3   :  { %s17_s13 = sshll.u32 %s482_s12, 4  ;;  %p411_p0 = scmp.ne.s32.totalorder %s761_s1, %s410_s16  ;;  %s18_s13 = int_to_ptr.vmem [resolvable:$true] %s17_s13 }
   0x4   :  { %p414_p1 = scmp.lt.u32.totalorder %s410_s16, %s761_s1 }
   0x6   :  { %p416_p2 = pnand %p414_p1, %p411_p0 }
   0x8   :  { %419 = shalt.err (!%p416_p2)
}
   0x9   :  { %s420_s21 = scalar_lea.vmem %s18_s13, 512  ;;  %p425_p4 = scmp.lt.s32.totalorder %s18_s13, %s18_s13 }
   0xa   :  { %p421_p3 = scmp.ne.s32.totalorder %s18_s13, %s420_s21  ;;  %p426_p5 = scmp.lt.s32.totalorder %s420_s21, %s420_s21 }
   0xc   :  { %p427_p6 = por %p426_p5, %p425_p4 }
   0xe   :  { %p428_p7 = pnand %p427_p6, %p421_p3 }
  0x10   :  { %431 = shalt.err (!%p428_p7)
}
  0x11   :  { %s483_s22 = smov 64   ;;  %s484_s23 = smov 4  }
  0x12   :  { %23 = dma.hbm_to_vmem [thread:$0]  %s761_s1, 512, %s18_s13, [#allocation5], %s483_s22, %s483_s22, %s484_s23  }
  0x13   :  { %s485_s26 = smov [#allocation7]   ;;  %s432_s30 = scalar_lea.hbm %s762_s2, 256 }
  0x14   :  { %s29_s27 = sshll.u32 %s485_s26, 4  ;;  %p433_p8 = scmp.ne.s32.totalorder %s762_s2, %s432_s30  ;;  %s30_s27 = int_to_ptr.vmem [resolvable:$true] %s29_s27 }
  0x15   :  { %p436_p9 = scmp.lt.u32.totalorder %s432_s30, %s762_s2 }
  0x17   :  { %p438_p10 = pnand %p436_p9, %p433_p8 }
  0x19   :  { %441 = shalt.err (!%p438_p10)
}
  0x1a   :  { %s442_s8 = scalar_lea.vmem %s30_s27, 256  ;;  %p447_p12 = scmp.lt.s32.totalorder %s30_s27, %s30_s27 }
  0x1b   :  { %p443_p11 = scmp.ne.s32.totalorder %s30_s27, %s442_s8  ;;  %p448_p13 = scmp.lt.s32.totalorder %s442_s8, %s442_s8 }
  0x1d   :  { %p449_p0 = por %p448_p13, %p447_p12 }
  0x1f   :  { %p450_p1 = pnand %p449_p0, %p443_p11 }
  0x21   :  { %453 = shalt.err (!%p450_p1)
}
  0x22   :  { %s486_s1 = smov 128   ;;  %s487_s9 = smov 8  }
  0x23   :  { %35 = dma.hbm_to_vmem [thread:$0]  %s762_s2, 256, %s30_s27, [#allocation8], %s486_s1, %s486_s1, %s487_s9  }
  0x24   :  { %476 = dma.done.wait [#allocation5], 512  }
  0x25   :  { %477 = vsyncadd [#allocation5], 4294966784 }
  0x26   :  { %478 = dma.done.wait [#allocation8], 256  }
  0x27   :  { %479 = vsyncadd [#allocation8], 4294967040  ;;  %v65_v0 = vld [vmem:[#allocation7] sm:$0xff]  ;;  %v66_v1 = vld [vmem:[#allocation7 + $0x8] sm:$0xff]  ;;  %s350_s13 = sadd.f32 -1.0, %s760_s0  ;;  %v488_v46 = vmov 0.0  }
  0x28   :  { %v67_v2 = vunpack.c.0.s8 %v65_v0  ;;  %v68_v3 = vunpack.c.1.s8 %v65_v0  ;;  %v69_v4 = vunpack.c.2.s8 %v65_v0  ;;  %v70_v5 = vunpack.c.3.s8 %v65_v0  ;;  %v352_v24 = vld [vmem:[#allocation4] sm:$0xff]   ;;  %v367_v25 = vld [vmem:[#allocation4 + $0x8] sm:$0xff]   ;;  %v368_v38 = vld [vmem:[#allocation4 + $0x10] sm:$0xff]   ;;  %s489_s0 = smov [#allocation9]  }
  0x29   :  { %v71_v6 = vunpack.c.0.s8 %v66_v1  ;;  %v72_v7 = vunpack.c.1.s8 %v66_v1  ;;  %v73_v8 = vunpack.c.2.s8 %v66_v1  ;;  %v74_v9 = vunpack.c.3.s8 %v66_v1  ;;  %v369_v39 = vld [vmem:[#allocation4 + $0x18] sm:$0xff]   ;;  %s324_s14 = sshll.u32 %s489_s0, 4  ;;  %s325_s14 = int_to_ptr.vmem [resolvable:$true] %s324_s14 }
  0x2a   :  { %v75_v10 = vcvt.s32.f32 %v67_v2  ;;  %v76_v11 = vcvt.s32.f32 %v68_v3  ;;  %v77_v12 = vcvt.s32.f32 %v69_v4  ;;  %v78_v13 = vcvt.s32.f32 %v70_v5  ;;  %s454_s15 = scalar_lea.vmem %s325_s14, 128  ;;  %p459_p3 = scmp.lt.s32.totalorder %s325_s14, %s325_s14 }
  0x2b   :  { %v79_v14 = vcvt.s32.f32 %v71_v6  ;;  %v80_v15 = vcvt.s32.f32 %v72_v7  ;;  %v81_v16 = vcvt.s32.f32 %v73_v8  ;;  %v82_v17 = vcvt.s32.f32 %v74_v9  ;;  %p455_p2 = scmp.ne.s32.totalorder %s325_s14, %s454_s15  ;;  %p460_p4 = scmp.lt.s32.totalorder %s454_s15, %s454_s15 }
  0x2c   :  { %vm83_vm0 = vcmp.ge.f32.partialorder %v75_v10, 3.0  ;;  %vm84_vm1 = vcmp.ge.f32.partialorder %v76_v11, 3.0  ;;  %v334_v18 = vadd.f32 -3.0, %v75_v10  ;;  %v335_v19 = vadd.f32 -3.0, %v76_v11 }
  0x2d   :  { %v336_v20 = vadd.f32 -3.0, %v77_v12  ;;  %v337_v21 = vadd.f32 -3.0, %v78_v13  ;;  %v338_v22 = vadd.f32 -3.0, %v79_v14  ;;  %v339_v23 = vadd.f32 -3.0, %v80_v15  ;;  %p461_p5 = por %p460_p4, %p459_p3 }
  0x2e   :  { %vm85_vm2 = vcmp.ge.f32.partialorder %v77_v12, 3.0  ;;  %vm86_vm3 = vcmp.ge.f32.partialorder %v78_v13, 3.0  ;;  %vm87_vm4 = vcmp.ge.f32.partialorder %v79_v14, 3.0  ;;  %vm88_vm5 = vcmp.ge.f32.partialorder %v80_v15, 3.0 }
  0x2f   :  { %v340_v26 = vadd.f32 -3.0, %v81_v16  ;;  %v341_v27 = vadd.f32 -3.0, %v82_v17  ;;  %vm89_vm6 = vcmp.ge.f32.partialorder %v81_v16, 3.0  ;;  %vm90_vm7 = vcmp.ge.f32.partialorder %v82_v17, 3.0  ;;  %p462_p6 = pnand %p461_p5, %p455_p2 }
  0x30   :  { %v99_v28 = vsel %vm83_vm0, %v334_v18, %v75_v10  ;;  %v100_v29 = vsel %vm84_vm1, %v335_v19, %v76_v11  ;;  %v101_v30 = vsel %vm85_vm2, %v336_v20, %v77_v12  ;;  %v102_v31 = vsel %vm86_vm3, %v337_v21, %v78_v13 }
  0x31   :  { %v103_v32 = vsel %vm87_vm4, %v338_v22, %v79_v14  ;;  %v104_v33 = vsel %vm88_vm5, %v339_v23, %v80_v15  ;;  %v536_v34 = vunpack.c.l.bf16 %v352_v24  ;;  %v538_v35 = vunpack.c.h.bf16 %v352_v24 }
  0x32   :  { %v540_v36 = vunpack.c.l.bf16 %v367_v25  ;;  %v542_v37 = vunpack.c.h.bf16 %v367_v25  ;;  %v105_v40 = vsel %vm89_vm6, %v340_v26, %v81_v16  ;;  %v106_v41 = vsel %vm90_vm7, %v341_v27, %v82_v17 }
  0x33   :  { %vm107_vm8 = vcmp.ne.f32.partialorder %v99_v28, 0.0  ;;  %vm108_vm9 = vcmp.ne.f32.partialorder %v100_v29, 0.0  ;;  %vm109_vm10 = vcmp.ne.f32.partialorder %v101_v30, 0.0  ;;  %vm110_vm11 = vcmp.ne.f32.partialorder %v102_v31, 0.0 }
  0x34   :  { %vm111_vm12 = vcmp.ne.f32.partialorder %v103_v32, 0.0  ;;  %vm112_vm13 = vcmp.ne.f32.partialorder %v104_v33, 0.0  ;;  %v544_v42 = vunpack.c.l.bf16 %v368_v38  ;;  %v546_v43 = vunpack.c.h.bf16 %v368_v38 }
  0x35   :  { %v548_v44 = vunpack.c.l.bf16 %v369_v39  ;;  %v550_v45 = vunpack.c.h.bf16 %v369_v39  ;;  %vm113_vm14 = vcmp.ne.f32.partialorder %v105_v40, 0.0  ;;  %vm114_vm15 = vcmp.ne.f32.partialorder %v106_v41, 0.0 }
  0x36   :  { %v555_v47 = vsel %vm107_vm8, 1.0, %v488_v46  ;;  %v557_v48 = vsel %vm108_vm9, 1.0, %v488_v46  ;;  %v559_v49 = vsel %vm109_vm10, 1.0, %v488_v46  ;;  %v561_v50 = vsel %vm110_vm11, 1.0, %v488_v46 }
  0x37   :  { %v563_v51 = vsel %vm111_vm12, 1.0, %v488_v46  ;;  %v565_v52 = vsel %vm112_vm13, 1.0, %v488_v46  ;;  %v147_v53 = vand.u32 2147483647, %v536_v34  ;;  %v148_v54 = vand.u32 2147483647, %v538_v35 }
  0x38   :  { %v149_v55 = vand.u32 2147483647, %v540_v36  ;;  %v150_v56 = vand.u32 2147483647, %v542_v37  ;;  %v151_v57 = vand.u32 2147483647, %v544_v42  ;;  %v573_v59 = vstv %s350_s13 }
  0x39   :  { %v152_v58 = vand.u32 2147483647, %v546_v43  ;;  %v576_v60 = vsel %vm113_vm14, 1.0, %v488_v46  ;;  %v153_v61 = vand.u32 2147483647, %v548_v44  ;;  %v155_v62 = vsub.f32 0.0, %v147_v53 }
  0x3a   :  { %v156_v63 = vsub.f32 0.0, %v148_v54  ;;  %v154_v0 = vand.u32 2147483647, %v550_v45  ;;  %v157_v1 = vsub.f32 0.0, %v149_v55  ;;  %v158_v2 = vsub.f32 0.0, %v150_v56 }
  0x3b   :  { %v159_v3 = vsub.f32 0.0, %v151_v57  ;;  %v131_v4 = vsub.f32 0.0, %v536_v34  ;;  %v160_v5 = vsub.f32 0.0, %v152_v58  ;;  %v163_v6 = vmul.f32 1.442695, %v155_v62 }
  0x3c   :  { %v165_v7 = vmul.f32 1.442695, %v156_v63  ;;  %v132_v8 = vsub.f32 0.0, %v538_v35  ;;  %v161_v9 = vsub.f32 0.0, %v153_v61  ;;  %v167_v10 = vmul.f32 1.442695, %v157_v1 }
  0x3d   :  { %v169_v11 = vmul.f32 1.442695, %v158_v2  ;;  %v133_v12 = vsub.f32 0.0, %v540_v36  ;;  %v134_v13 = vsub.f32 0.0, %v542_v37  ;;  %378 = vpow2.f32 %v163_v6 }
  0x3e   :  { %v171_v14 = vmul.f32 1.442695, %v159_v3  ;;  %v585_v15 = vsel %vm114_vm15, 1.0, %v488_v46  ;;  %v135_v16 = vsub.f32 0.0, %v544_v42  ;;  %v162_v17 = vsub.f32 0.0, %v154_v0 }
  0x3f   :  { %380 = vpow2.f32 %v165_v7  ;;  %v136_v18 = vsub.f32 0.0, %v546_v43  ;;  %v137_v19 = vsub.f32 0.0, %v548_v44  ;;  %v173_v20 = vmul.f32 1.442695, %v160_v5 }
  0x40   :  { %382 = vpow2.f32 %v167_v10  ;;  %v138_v21 = vsub.f32 0.0, %v550_v45  ;;  %v591_v22 = vmax.f32 %v131_v4, 0.0  ;;  %v175_v23 = vmul.f32 1.442695, %v161_v9 }
  0x41   :  { %384 = vpow2.f32 %v169_v11  ;;  %v593_v24 = vmax.f32 %v132_v8, 0.0  ;;  %v595_v25 = vmax.f32 %v133_v12, 0.0  ;;  %v597_v26 = vmax.f32 %v134_v13, 0.0 }
  0x42   :  { %386 = vpow2.f32 %v171_v14  ;;  %v599_v27 = vmax.f32 %v135_v16, 0.0  ;;  %v177_v28 = vmul.f32 1.442695, %v162_v17  ;;  %v259_v29 = vsub.f32 1.0, %v555_v47 }
  0x43   :  { %v260_v30 = vsub.f32 1.0, %v557_v48  ;;  %388 = vpow2.f32 %v173_v20  ;;  %v261_v31 = vsub.f32 1.0, %v559_v49  ;;  %v262_v32 = vsub.f32 1.0, %v561_v50 }
  0x44   :  { %v263_v33 = vsub.f32 1.0, %v563_v51  ;;  %v606_v38 = vmax.f32 %v136_v18, 0.0  ;;  %390 = vpow2.f32 %v175_v23  ;;  %v264_v39 = vsub.f32 1.0, %v565_v52 }
  0x45   :  { %v265_v40 = vsub.f32 1.0, %v576_v60  ;;  %v610_v41 = vmax.f32 %v137_v19, 0.0  ;;  %v612_v46 = vmax.f32 %v138_v21, 0.0  ;;  %v277_v53 = vmul.f32 %v555_v47, %v573_v59 }
  0x46   :  { %v278_v54 = vmul.f32 %v557_v48, %v573_v59  ;;  %392 = vpow2.f32 %v177_v28  ;;  %v266_v55 = vsub.f32 1.0, %v585_v15  ;;  %v620_v56 = vmul.f32 %v536_v34, %v259_v29 }
  0x47   :  { %v279_v57 = vmul.f32 %v559_v49, %v573_v59  ;;  %v379_v58 = vpop.eup %378  ;;  %v625_v61 = vmul.f32 %v538_v35, %v260_v30  ;;  %v628_v62 = vmul.f32 %v540_v36, %v261_v31  ;;  %v631_v47 = vmul.f32 %v542_v37, %v262_v32 }
  0x48   :  { %v634_v48 = vmul.f32 %v544_v42, %v263_v33  ;;  %v179_v0 = vadd.f32 1.0, %v379_v58  ;;  %v637_v34 = vmul.f32 %v546_v43, %v264_v39  ;;  %v640_v49 = vmul.f32 %v548_v44, %v265_v40 }
  0x49   :  { %v381_v63 = vpop.eup %380  ;;  %v280_v35 = vmul.f32 %v561_v50, %v573_v59  ;;  %v182_v36 = vmul.f32 -0.5, %v379_v58  ;;  %v281_v37 = vmul.f32 %v563_v51, %v573_v59  ;;  %v282_v42 = vmul.f32 %v565_v52, %v573_v59 }
  0x4a   :  { %v383_v1 = vpop.eup %382  ;;  %v188_v2 = vadd.f32 1.0, %v381_v63  ;;  %394 = vlog2.f32 %v179_v0  ;;  %v650_v43 = vmul.f32 %v576_v60, %v573_v59  ;;  %v654_v44 = vmul.f32 %v585_v15, %v573_v59 }
  0x4b   :  { %v385_v3 = vpop.eup %384  ;;  %v197_v4 = vadd.f32 1.0, %v383_v1  ;;  %v185_v5 = vand.u32 2147483647, %v379_v58  ;;  %v191_v6 = vmul.f32 -0.5, %v381_v63  ;;  %v656_v7 = vadd.f32 1.0, %v277_v53 }
  0x4c   :  { %v387_v50 = vpop.eup %386  ;;  %396 = vlog2.f32 %v188_v2  ;;  %v200_v51 = vmul.f32 -0.5, %v383_v1  ;;  %v206_v52 = vadd.f32 1.0, %v385_v3  ;;  %v658_v8 = vadd.f32 1.0, %v278_v54 }
  0x4d   :  { %398 = vlog2.f32 %v197_v4  ;;  %v389_v9 = vpop.eup %388  ;;  %v183_v10 = vadd.f32 1.0, %v182_v36  ;;  %v194_v11 = vand.u32 2147483647, %v381_v63  ;;  %v660_v60 = vadd.f32 1.0, %v279_v57 }
  0x4e   :  { %v662_v12 = vadd.f32 1.0, %v280_v35  ;;  %v664_v59 = vpop.eup %390  ;;  %400 = vlog2.f32 %v206_v52  ;;  %v209_v13 = vmul.f32 -0.5, %v385_v3  ;;  %v215_v14 = vadd.f32 1.0, %v387_v50 }
  0x4f   :  { %v666_v16 = vadd.f32 1.0, %v281_v37  ;;  %vm668_vm0 = vcmp.lt.f32.partialorder %v185_v5, 0.0004427343  ;;  %v192_v18 = vadd.f32 1.0, %v191_v6  ;;  %v218_v19 = vmul.f32 -0.5, %v387_v50 }
  0x50   :  { %v672_v20 = vadd.f32 1.0, %v282_v42  ;;  %v674_v21 = vpop.eup %392  ;;  %v201_v23 = vadd.f32 1.0, %v200_v51  ;;  %v203_v28 = vand.u32 2147483647, %v383_v1  ;;  %402 = vlog2.f32 %v215_v14 }
  0x51   :  { %v224_v29 = vadd.f32 1.0, %v389_v9  ;;  %v184_v30 = vmul.f32 %v379_v58, %v183_v10  ;;  %vm676_vm1 = vcmp.lt.f32.partialorder %v194_v11, 0.0004427343  ;;  %v212_v32 = vand.u32 2147483647, %v385_v3 }
  0x52   :  { %v233_v33 = vadd.f32 1.0, %v664_v59  ;;  %v210_v39 = vadd.f32 1.0, %v209_v13  ;;  %v221_v40 = vand.u32 2147483647, %v387_v50  ;;  %v227_v53 = vmul.f32 -0.5, %v389_v9 }
  0x53   :  { %404 = vlog2.f32 %v224_v29  ;;  %v193_v54 = vmul.f32 %v381_v63, %v192_v18  ;;  %v219_v57 = vadd.f32 1.0, %v218_v19  ;;  %v242_v0 = vadd.f32 1.0, %v674_v21 }
  0x54   :  { %406 = vlog2.f32 %v233_v33  ;;  %v395_v35 = vpop.eup %394  ;;  %v202_v36 = vmul.f32 %v383_v1, %v201_v23  ;;  %vm682_vm2 = vcmp.lt.f32.partialorder %v203_v28, 0.0004427343  ;;  %v230_v2 = vand.u32 2147483647, %v389_v9 }
  0x55   :  { %v236_v37 = vmul.f32 -0.5, %v664_v59  ;;  %v181_v4 = vmul.f32 0.6931472, %v395_v35  ;;  %vm687_vm3 = vcmp.lt.f32.partialorder %v212_v32, 0.0004427343  ;;  %408 = vlog2.f32 %v242_v0 }
  0x56   :  { %v397_v42 = vpop.eup %396  ;;  %v245_v63 = vmul.f32 -0.5, %v674_v21  ;;  %v211_v52 = vmul.f32 %v385_v3, %v210_v39  ;;  %vm692_vm4 = vcmp.lt.f32.partialorder %v221_v40, 0.0004427343  ;;  %v228_v10 = vadd.f32 1.0, %v227_v53 }
  0x57   :  { %v399_v6 = vpop.eup %398  ;;  %v190_v51 = vmul.f32 0.6931472, %v397_v42  ;;  %v187_v11 = vsel %vm668_vm0, %v184_v30, %v181_v4  ;;  %v220_v14 = vmul.f32 %v387_v50, %v219_v57  ;;  %v239_v18 = vand.u32 2147483647, %v664_v59 }
  0x58   :  { %v199_v13 = vmul.f32 0.6931472, %v399_v6  ;;  %v401_v19 = vpop.eup %400  ;;  %vm701_vm5 = vcmp.lt.f32.partialorder %v230_v2, 0.0004427343  ;;  %v237_v3 = vadd.f32 1.0, %v236_v37  ;;  %v251_v29 = vadd.f32 %v187_v11, %v591_v22 }
  0x59   :  { %v196_v23 = vsel %vm676_vm1, %v193_v54, %v190_v51  ;;  %v208_v17 = vmul.f32 0.6931472, %v401_v19  ;;  %v246_v30 = vadd.f32 1.0, %v245_v63  ;;  %v229_v39 = vmul.f32 %v389_v9, %v228_v10 }
  0x5a   :  { %v205_v32 = vsel %vm682_vm2, %v202_v36, %v199_v13  ;;  %v252_v50 = vadd.f32 %v196_v23, %v593_v24  ;;  %v403_v33 = vpop.eup %402  ;;  %v248_v40 = vand.u32 2147483647, %v674_v21  ;;  %v293_v53 = vmul.f32 %v656_v7, %v251_v29 }
  0x5b   :  { %v253_v31 = vadd.f32 %v205_v32, %v595_v25  ;;  %v214_v54 = vsel %vm687_vm3, %v211_v52, %v208_v17  ;;  %v217_v57 = vmul.f32 0.6931472, %v403_v33  ;;  %vm714_vm6 = vcmp.lt.f32.partialorder %v239_v18, 0.0004427343 }
  0x5c   :  { %v294_v0 = vmul.f32 %v658_v8, %v252_v50  ;;  %v238_v24 = vmul.f32 %v664_v59, %v237_v3  ;;  %v254_v9 = vadd.f32 %v214_v54, %v597_v26  ;;  %v301_v25 = vadd.f32 %v293_v53, %v620_v56 }
  0x5d   :  { %v405_v35 = vpop.eup %404  ;;  %v295_v36 = vmul.f32 %v660_v60, %v253_v31  ;;  %v223_v58 = vsel %vm692_vm4, %v220_v14, %v217_v57  ;;  %v247_v37 = vmul.f32 %v674_v21, %v246_v30  ;;  %vm249_vm7 = vcmp.lt.f32.partialorder %v248_v40, 0.0004427343 }
  0x5e   :  { %v407_v7 = vpop.eup %406  ;;  %v226_v2 = vmul.f32 0.6931472, %v405_v35  ;;  %v302_v42 = vadd.f32 %v294_v0, %v625_v61  ;;  %v255_v8 = vadd.f32 %v223_v58, %v599_v27  ;;  %v296_v59 = vmul.f32 %v662_v12, %v254_v9 }
  0x5f   :  { %v235_v4 = vmul.f32 0.6931472, %v407_v7  ;;  %v303_v26 = vadd.f32 %v295_v36, %v628_v62  ;;  %v409_v5 = vpop.eup %408  ;;  %v291_v60 = vadd.f32 1.0, %v650_v43  ;;  %v292_v62 = vadd.f32 1.0, %v654_v44 }
  0x60   :  { %v232_v56 = vsel %vm701_vm5, %v229_v39, %v226_v2  ;;  %v309_v63 = vadd.f32 %v302_v42, %v301_v25  ;;  %v244_v6 = vmul.f32 0.6931472, %v409_v5  ;;  %v297_v27 = vmul.f32 %v666_v16, %v255_v8 }
  0x61   :  { %v241_v21 = vsel %vm714_vm6, %v238_v24, %v235_v4  ;;  %v256_v61 = vadd.f32 %v232_v56, %v606_v38  ;;  %v304_v51 = vadd.f32 %v296_v59, %v631_v47  ;;  %v274_v38 = vmul.f32 %v550_v45, %v266_v55 }
  0x62   :  { %v257_v12 = vadd.f32 %v241_v21, %v610_v41  ;;  %v310_v52 = vadd.f32 %v309_v63, %v303_v26  ;;  %v250_v1 = vsel %vm249_vm7, %v247_v37, %v244_v6  ;;  %v305_v43 = vadd.f32 %v297_v27, %v634_v48 }
  0x63   :  { %v298_v10 = vmul.f32 %v672_v20, %v256_v61  ;;  %v258_v11 = vadd.f32 %v250_v1, %v612_v46 }
  0x64   :  { %v299_v13 = vmul.f32 %v291_v60, %v257_v12  ;;  %v311_v16 = vadd.f32 %v310_v52, %v304_v51 }
  0x65   :  { %v306_v41 = vadd.f32 %v298_v10, %v637_v34  ;;  %v300_v14 = vmul.f32 %v292_v62, %v258_v11 }
  0x66   :  { %v307_v44 = vadd.f32 %v299_v13, %v640_v49  ;;  %v312_v47 = vadd.f32 %v311_v16, %v305_v43 }
  0x67   :  { %v308_v18 = vadd.f32 %v300_v14, %v274_v38 }
  0x68   :  { %v313_v19 = vadd.f32 %v312_v47, %v306_v41 }
  0x6a   :  { %v314_v23 = vadd.f32 %v313_v19, %v307_v44 }
  0x6c   :  { %v315_v48 = vadd.f32 %v314_v23, %v308_v18 }
  0x6e   :  { %317 = vst [vmem:[#allocation9] sm:$0xff] %v315_v48 }
  0x6f   :  { %465 = shalt.err (!%p462_p6)
}
  0x70   :  { %s466_s18 = scalar_lea.hbm %s763_s3, 128 }
  0x71   :  { %p467_p7 = scmp.ne.s32.totalorder %s763_s3, %s466_s18  ;;  %p470_p8 = scmp.lt.u32.totalorder %s466_s18, %s763_s3 }
  0x73   :  { %p472_p9 = pnand %p470_p8, %p467_p7 }
  0x75   :  { %475 = shalt.err (!%p472_p9)
}
  0x76   :  { %327 = dma.vmem_to_hbm [thread:$0]  %s325_s14, 128, %s763_s3, [#allocation6]  }
  0x77   :  { %480 = dma.done.wait [#allocation6], 128  }
  0x78   :  { %481 = vsyncadd [#allocation6], 4294967168 }
  0x79   :  { %331 = vsyncpa [#allocation5], 1 }
  0x7a   :  { %332 = vsyncpa [#allocation8], 1 }
  0x7b   :  { %333 = vsyncpa [#allocation6], 1 }

</bundles_post_ra>
